<compile_context>
chip_gen: v5e
topology: v5e:2x2
jax: 0.10.0
libtpu: 0.0.40
codegen_flags: <defaults>
</compile_context>

<pallas_src>
import functools

import jax
import jax.numpy as jnp
from jax.experimental import pallas as pl
from jax.experimental.pallas import tpu as pltpu

BN_EPS = 1e-5
HID_LAST = 256               # width of the last hidden layer
MAX_TILE_N = 4096            # cap on the final-layer output tile (lanes)


def _round_up(x, m):
    return ((x + m - 1) // m) * m


# --------------------------------------------------------------------------
# Fused kernel: 3 x [Linear -> BatchNorm1d(batch stats) -> ReLU]  (recomputed
# per grid step, tiny) followed by the N-tiled final Linear + Sigmoid.
# --------------------------------------------------------------------------
def decoder_kernel(z_ref,
                   w0_ref, b0_ref,
                   w1_ref, b1_ref,
                   w2_ref, b2_ref,
                   w3_ref, b3_ref,
                   out_ref):
    def block(x, w_ref, b_ref):
        # bf16 x bf16 matmul on the MXU, f32 accumulation; f32 bias add.
        h = jnp.dot(x, w_ref[...], preferred_element_type=jnp.float32) + b_ref[...]
        # Single-pass batch statistics (training-mode BN, gamma=1, beta=0).
        n = h.shape[0]
        s1 = jnp.sum(h, axis=0, keepdims=True)
        s2 = jnp.sum(h * h, axis=0, keepdims=True)
        mu = s1 * (1.0 / n)
        var = jnp.maximum(s2 * (1.0 / n) - mu * mu, 0.0)   # biased var, clamped
        hn = (h - mu) * jax.lax.rsqrt(var + BN_EPS)
        return jnp.maximum(hn, 0.0).astype(jnp.bfloat16)

    x = z_ref[...].astype(jnp.bfloat16)
    x = block(x, w0_ref, b0_ref)
    x = block(x, w1_ref, b1_ref)
    x = block(x, w2_ref, b2_ref)

    # Final Linear on this output-feature tile + Sigmoid.
    h = jnp.dot(x, w3_ref[...], preferred_element_type=jnp.float32) + b3_ref[...]
    # sigmoid(h) = 0.5 * (tanh(0.5 h) + 1): a single EUP op on the widest tensor.
    out_ref[...] = (0.5 * (jnp.tanh(0.5 * h) + 1.0)).astype(out_ref.dtype)


# --------------------------------------------------------------------------
# Parameter init (mimics nn.Linear default U(-1/sqrt(fan_in), 1/sqrt(fan_in)))
# --------------------------------------------------------------------------
def init_decoder_params(key, shape, nhid=16, ncond=0):
    """Weights stored transposed (in, out) in bf16; biases (1, out) in f32."""
    c, w, h = shape
    cwh = c * w * h
    dims = [nhid + ncond, 64, 128, HID_LAST, cwh]
    params = []
    for i in range(len(dims) - 1):
        fan_in, fan_out = dims[i], dims[i + 1]
        key, kw, kb = jax.random.split(key, 3)
        bound = 1.0 / (fan_in ** 0.5)
        W = jax.random.uniform(kw, (fan_in, fan_out), jnp.float32, -bound, bound)
        b = jax.random.uniform(kb, (1, fan_out), jnp.float32, -bound, bound)
        params.append((W.astype(jnp.bfloat16), b))
    return params


# --------------------------------------------------------------------------
# Forward wrapper
# --------------------------------------------------------------------------
@functools.partial(jax.jit, static_argnames=("shape",))
def decoder_forward(z, params, shape):
    """z: (B, nhid [+ncond]) float32  ->  (B, c, w, h) float32."""
    c, w, h = shape
    cwh = c * w * h
    B, nin = z.shape
    (w0, b0), (w1, b1), (w2, b2), (w3, b3) = params

    tn = min(MAX_TILE_N, _round_up(cwh, 128))
    n_tiles = pl.cdiv(cwh, tn)

    # Rough advisory cost for the XLA scheduler.
    hid_flops = 2 * B * (nin * 64 + 64 * 128 + 128 * HID_LAST)
    flops = n_tiles * hid_flops + 2 * B * HID_LAST * cwh
    transc = n_tiles * (64 + 128 + HID_LAST) + B * cwh          # rsqrt + tanh
    bytes_acc = (z.size * 4
                 + sum(int(W.size) * 2 + int(b.size) * 4
                       for (W, b) in ((w0, b0), (w1, b1), (w2, b2)))
                 + HID_LAST * cwh * 2 + cwh * 4 + B * cwh * 4)

    resident = lambda shp: pl.BlockSpec(shp, lambda j: (0, 0))

    out_flat = pl.pallas_call(
        decoder_kernel,
        out_shape=jax.ShapeDtypeStruct((B, cwh), jnp.float32),
        grid=(n_tiles,),
        in_specs=[
            resident(z.shape),                                  # z (resident)
            resident(w0.shape), resident(b0.shape),             # hidden weights
            resident(w1.shape), resident(b1.shape),
            resident(w2.shape), resident(b2.shape),
            pl.BlockSpec((HID_LAST, tn), lambda j: (0, j)),     # W3 tile (streamed)
            pl.BlockSpec((1, tn), lambda j: (0, j)),            # b3 tile
        ],
        out_specs=pl.BlockSpec((B, tn), lambda j: (0, j)),
        compiler_params=pltpu.CompilerParams(
            dimension_semantics=("parallel",),      # v7x: split tiles across 2 TCs
            vmem_limit_bytes=32 * 1024 * 1024),
        cost_estimate=pl.CostEstimate(
            flops=flops, transcendentals=transc, bytes_accessed=bytes_acc),
    )(z, w0, b0, w1, b1, w2, b2, w3, b3)

    return out_flat.reshape(B, c, w, h)


# --------------------------------------------------------------------------
# Pure-JAX reference (mirrors the kernel's bf16-matmul precision)
# --------------------------------------------------------------------------
def decoder_ref(z, params, shape):
    c, w, h = shape
    x = z
    n_layers = len(params)
    for i, (W, b) in enumerate(params):
        hh = jnp.dot(x.astype(jnp.bfloat16), W,
                     preferred_element_type=jnp.float32) + b
        if i < n_layers - 1:
            mu = jnp.mean(hh, axis=0, keepdims=True)
            var = jnp.mean((hh - mu) ** 2, axis=0, keepdims=True)
            x = jnp.maximum((hh - mu) * jax.lax.rsqrt(var + BN_EPS),
                            0.0).astype(jnp.bfloat16)
        else:
            x = jax.nn.sigmoid(hh)
    return x.reshape(-1, c, w, h)


if __name__ == "__main__":
    key = jax.random.PRNGKey(0)
    shape = (1, 16, 16)    # (c, w, h) -> flat output dim 256
    nhid = 16
    ncond = 0
    batch = 8              # NOTE: small batch underfills the MXU; batch
                           # requests (>=128/256, multiple of 16) for throughput.

    kz, kp = jax.random.split(key)
    z = jax.random.normal(kz, (batch, nhid + ncond), jnp.float32)
    params = init_decoder_params(kp, shape, nhid=nhid, ncond=ncond)

    out = decoder_forward(z, params, shape)
    out = jax.block_until_ready(out)

    ref = decoder_ref(z, params, shape)
    assert out.shape == (batch, *shape)
    # Exact-form sigmoid (tanh) + f32 accumulation -> tight tolerance.
    assert jnp.allclose(out, ref, atol=1e-3, rtol=0.0), (
        float(jnp.max(jnp.abs(out - ref))))

    print("KERNEL_OK")
</pallas_src>

<mosaic_0001>
module attributes {stable_mosaic.version = 11 : i64} {
  func.func @decoder_kernel(%arg0: i32, %arg1: memref<8x16xf32, #tpu.memory_space<vmem>>, %arg2: memref<16x64xbf16, #tpu.memory_space<vmem>>, %arg3: memref<1x64xf32, #tpu.memory_space<vmem>>, %arg4: memref<64x128xbf16, #tpu.memory_space<vmem>>, %arg5: memref<1x128xf32, #tpu.memory_space<vmem>>, %arg6: memref<128x256xbf16, #tpu.memory_space<vmem>>, %arg7: memref<1x256xf32, #tpu.memory_space<vmem>>, %arg8: memref<256x256xbf16, #tpu.memory_space<vmem>>, %arg9: memref<1x256xf32, #tpu.memory_space<vmem>>, %arg10: memref<8x256xf32, #tpu.memory_space<vmem>>) attributes {dimension_semantics = [#tpu.dimension_semantics<parallel>], iteration_bounds = array<i64: 1>, scalar_prefetch = 0 : i64, scratch_operands = 0 : i64, tpu.core_type = #tpu.core_type<tc>, window_params = [{pipeline_mode = #tpu.pipeline_mode<synchronous>, transform_indices = @transform_0, window_bounds = array<i64: 8, 16>}, {pipeline_mode = #tpu.pipeline_mode<synchronous>, transform_indices = @transform_1, window_bounds = array<i64: 16, 64>}, {pipeline_mode = #tpu.pipeline_mode<synchronous>, transform_indices = @transform_2, window_bounds = array<i64: 1, 64>}, {pipeline_mode = #tpu.pipeline_mode<synchronous>, transform_indices = @transform_3, window_bounds = array<i64: 64, 128>}, {pipeline_mode = #tpu.pipeline_mode<synchronous>, transform_indices = @transform_4, window_bounds = array<i64: 1, 128>}, {pipeline_mode = #tpu.pipeline_mode<synchronous>, transform_indices = @transform_5, window_bounds = array<i64: 128, 256>}, {pipeline_mode = #tpu.pipeline_mode<synchronous>, transform_indices = @transform_6, window_bounds = array<i64: 1, 256>}, {transform_indices = @transform_7, window_bounds = array<i64: 256, 256>}, {transform_indices = @transform_8, window_bounds = array<i64: 1, 256>}, {transform_indices = @transform_9, window_bounds = array<i64: 8, 256>}]} {
    %c0 = arith.constant 0 : index
    %c0_0 = arith.constant 0 : index
    %0 = vector.load %arg1[%c0, %c0_0] : memref<8x16xf32, #tpu.memory_space<vmem>>, vector<8x16xf32>
    %1 = arith.truncf %0 : vector<8x16xf32> to vector<8x16xbf16>
    %c0_1 = arith.constant 0 : index
    %c0_2 = arith.constant 0 : index
    %2 = vector.load %arg2[%c0_1, %c0_2] : memref<16x64xbf16, #tpu.memory_space<vmem>>, vector<16x64xbf16>
    %cst = arith.constant dense<0.000000e+00> : vector<8x64xf32>
    %3 = tpu.matmul %1, %2, %cst {dimension_numbers = #tpu.dot_dimension_numbers<[1], [0], [0], [1], [0, 0, 1, 1], [], []>} : vector<8x16xbf16>, vector<16x64xbf16>, vector<8x64xf32> -> vector<8x64xf32>
    %c0_3 = arith.constant 0 : index
    %c0_4 = arith.constant 0 : index
    %4 = vector.load %arg3[%c0_3, %c0_4] : memref<1x64xf32, #tpu.memory_space<vmem>>, vector<1x64xf32>
    %5 = vector.broadcast %4 : vector<1x64xf32> to vector<8x64xf32>
    %6 = arith.addf %3, %5 : vector<8x64xf32>
    %cst_5 = arith.constant dense<0.000000e+00> : vector<64xf32>
    %7 = vector.multi_reduction <add>, %6, %cst_5 [0] : vector<8x64xf32> to vector<64xf32>
    %8 = vector.shape_cast %7 : vector<64xf32> to vector<1x64xf32>
    %9 = arith.mulf %6, %6 : vector<8x64xf32>
    %cst_6 = arith.constant dense<0.000000e+00> : vector<64xf32>
    %10 = vector.multi_reduction <add>, %9, %cst_6 [0] : vector<8x64xf32> to vector<64xf32>
    %11 = vector.shape_cast %10 : vector<64xf32> to vector<1x64xf32>
    %cst_7 = arith.constant 1.250000e-01 : f32
    %12 = vector.broadcast %cst_7 : f32 to vector<1x64xf32>
    %13 = arith.mulf %8, %12 : vector<1x64xf32>
    %cst_8 = arith.constant 1.250000e-01 : f32
    %14 = vector.broadcast %cst_8 : f32 to vector<1x64xf32>
    %15 = arith.mulf %11, %14 : vector<1x64xf32>
    %16 = arith.mulf %13, %13 : vector<1x64xf32>
    %17 = arith.subf %15, %16 : vector<1x64xf32>
    %cst_9 = arith.constant 0.000000e+00 : f32
    %18 = vector.broadcast %cst_9 : f32 to vector<1x64xf32>
    %19 = arith.maximumf %17, %18 : vector<1x64xf32>
    %20 = vector.broadcast %13 : vector<1x64xf32> to vector<8x64xf32>
    %21 = arith.subf %6, %20 : vector<8x64xf32>
    %cst_10 = arith.constant 9.99999974E-6 : f32
    %22 = vector.broadcast %cst_10 : f32 to vector<1x64xf32>
    %23 = arith.addf %19, %22 : vector<1x64xf32>
    %24 = math.rsqrt %23 : vector<1x64xf32>
    %25 = vector.broadcast %24 : vector<1x64xf32> to vector<8x64xf32>
    %26 = arith.mulf %21, %25 : vector<8x64xf32>
    %cst_11 = arith.constant 0.000000e+00 : f32
    %27 = vector.broadcast %cst_11 : f32 to vector<8x64xf32>
    %28 = arith.maximumf %26, %27 : vector<8x64xf32>
    %29 = arith.truncf %28 : vector<8x64xf32> to vector<8x64xbf16>
    %c0_12 = arith.constant 0 : index
    %c0_13 = arith.constant 0 : index
    %30 = vector.load %arg4[%c0_12, %c0_13] : memref<64x128xbf16, #tpu.memory_space<vmem>>, vector<64x128xbf16>
    %cst_14 = arith.constant dense<0.000000e+00> : vector<8x128xf32>
    %31 = tpu.matmul %29, %30, %cst_14 {dimension_numbers = #tpu.dot_dimension_numbers<[1], [0], [0], [1], [0, 0, 1, 1], [], []>} : vector<8x64xbf16>, vector<64x128xbf16>, vector<8x128xf32> -> vector<8x128xf32>
    %c0_15 = arith.constant 0 : index
    %c0_16 = arith.constant 0 : index
    %32 = vector.load %arg5[%c0_15, %c0_16] : memref<1x128xf32, #tpu.memory_space<vmem>>, vector<1x128xf32>
    %33 = vector.broadcast %32 : vector<1x128xf32> to vector<8x128xf32>
    %34 = arith.addf %31, %33 : vector<8x128xf32>
    %cst_17 = arith.constant dense<0.000000e+00> : vector<128xf32>
    %35 = vector.multi_reduction <add>, %34, %cst_17 [0] : vector<8x128xf32> to vector<128xf32>
    %36 = vector.shape_cast %35 : vector<128xf32> to vector<1x128xf32>
    %37 = arith.mulf %34, %34 : vector<8x128xf32>
    %cst_18 = arith.constant dense<0.000000e+00> : vector<128xf32>
    %38 = vector.multi_reduction <add>, %37, %cst_18 [0] : vector<8x128xf32> to vector<128xf32>
    %39 = vector.shape_cast %38 : vector<128xf32> to vector<1x128xf32>
    %cst_19 = arith.constant 1.250000e-01 : f32
    %40 = vector.broadcast %cst_19 : f32 to vector<1x128xf32>
    %41 = arith.mulf %36, %40 : vector<1x128xf32>
    %cst_20 = arith.constant 1.250000e-01 : f32
    %42 = vector.broadcast %cst_20 : f32 to vector<1x128xf32>
    %43 = arith.mulf %39, %42 : vector<1x128xf32>
    %44 = arith.mulf %41, %41 : vector<1x128xf32>
    %45 = arith.subf %43, %44 : vector<1x128xf32>
    %cst_21 = arith.constant 0.000000e+00 : f32
    %46 = vector.broadcast %cst_21 : f32 to vector<1x128xf32>
    %47 = arith.maximumf %45, %46 : vector<1x128xf32>
    %48 = vector.broadcast %41 : vector<1x128xf32> to vector<8x128xf32>
    %49 = arith.subf %34, %48 : vector<8x128xf32>
    %cst_22 = arith.constant 9.99999974E-6 : f32
    %50 = vector.broadcast %cst_22 : f32 to vector<1x128xf32>
    %51 = arith.addf %47, %50 : vector<1x128xf32>
    %52 = math.rsqrt %51 : vector<1x128xf32>
    %53 = vector.broadcast %52 : vector<1x128xf32> to vector<8x128xf32>
    %54 = arith.mulf %49, %53 : vector<8x128xf32>
    %cst_23 = arith.constant 0.000000e+00 : f32
    %55 = vector.broadcast %cst_23 : f32 to vector<8x128xf32>
    %56 = arith.maximumf %54, %55 : vector<8x128xf32>
    %57 = arith.truncf %56 : vector<8x128xf32> to vector<8x128xbf16>
    %c0_24 = arith.constant 0 : index
    %c0_25 = arith.constant 0 : index
    %58 = vector.load %arg6[%c0_24, %c0_25] : memref<128x256xbf16, #tpu.memory_space<vmem>>, vector<128x256xbf16>
    %cst_26 = arith.constant dense<0.000000e+00> : vector<8x256xf32>
    %59 = tpu.matmul %57, %58, %cst_26 {dimension_numbers = #tpu.dot_dimension_numbers<[1], [0], [0], [1], [0, 0, 1, 1], [], []>} : vector<8x128xbf16>, vector<128x256xbf16>, vector<8x256xf32> -> vector<8x256xf32>
    %c0_27 = arith.constant 0 : index
    %c0_28 = arith.constant 0 : index
    %60 = vector.load %arg7[%c0_27, %c0_28] : memref<1x256xf32, #tpu.memory_space<vmem>>, vector<1x256xf32>
    %61 = vector.broadcast %60 : vector<1x256xf32> to vector<8x256xf32>
    %62 = arith.addf %59, %61 : vector<8x256xf32>
    %cst_29 = arith.constant dense<0.000000e+00> : vector<256xf32>
    %63 = vector.multi_reduction <add>, %62, %cst_29 [0] : vector<8x256xf32> to vector<256xf32>
    %64 = vector.shape_cast %63 : vector<256xf32> to vector<1x256xf32>
    %65 = arith.mulf %62, %62 : vector<8x256xf32>
    %cst_30 = arith.constant dense<0.000000e+00> : vector<256xf32>
    %66 = vector.multi_reduction <add>, %65, %cst_30 [0] : vector<8x256xf32> to vector<256xf32>
    %67 = vector.shape_cast %66 : vector<256xf32> to vector<1x256xf32>
    %cst_31 = arith.constant 1.250000e-01 : f32
    %68 = vector.broadcast %cst_31 : f32 to vector<1x256xf32>
    %69 = arith.mulf %64, %68 : vector<1x256xf32>
    %cst_32 = arith.constant 1.250000e-01 : f32
    %70 = vector.broadcast %cst_32 : f32 to vector<1x256xf32>
    %71 = arith.mulf %67, %70 : vector<1x256xf32>
    %72 = arith.mulf %69, %69 : vector<1x256xf32>
    %73 = arith.subf %71, %72 : vector<1x256xf32>
    %cst_33 = arith.constant 0.000000e+00 : f32
    %74 = vector.broadcast %cst_33 : f32 to vector<1x256xf32>
    %75 = arith.maximumf %73, %74 : vector<1x256xf32>
    %76 = vector.broadcast %69 : vector<1x256xf32> to vector<8x256xf32>
    %77 = arith.subf %62, %76 : vector<8x256xf32>
    %cst_34 = arith.constant 9.99999974E-6 : f32
    %78 = vector.broadcast %cst_34 : f32 to vector<1x256xf32>
    %79 = arith.addf %75, %78 : vector<1x256xf32>
    %80 = math.rsqrt %79 : vector<1x256xf32>
    %81 = vector.broadcast %80 : vector<1x256xf32> to vector<8x256xf32>
    %82 = arith.mulf %77, %81 : vector<8x256xf32>
    %cst_35 = arith.constant 0.000000e+00 : f32
    %83 = vector.broadcast %cst_35 : f32 to vector<8x256xf32>
    %84 = arith.maximumf %82, %83 : vector<8x256xf32>
    %85 = arith.truncf %84 : vector<8x256xf32> to vector<8x256xbf16>
    %c0_36 = arith.constant 0 : index
    %c0_37 = arith.constant 0 : index
    %86 = vector.load %arg8[%c0_36, %c0_37] : memref<256x256xbf16, #tpu.memory_space<vmem>>, vector<256x256xbf16>
    %cst_38 = arith.constant dense<0.000000e+00> : vector<8x256xf32>
    %87 = tpu.matmul %85, %86, %cst_38 {dimension_numbers = #tpu.dot_dimension_numbers<[1], [0], [0], [1], [0, 0, 1, 1], [], []>} : vector<8x256xbf16>, vector<256x256xbf16>, vector<8x256xf32> -> vector<8x256xf32>
    %c0_39 = arith.constant 0 : index
    %c0_40 = arith.constant 0 : index
    %88 = vector.load %arg9[%c0_39, %c0_40] : memref<1x256xf32, #tpu.memory_space<vmem>>, vector<1x256xf32>
    %89 = vector.broadcast %88 : vector<1x256xf32> to vector<8x256xf32>
    %90 = arith.addf %87, %89 : vector<8x256xf32>
    %cst_41 = arith.constant 5.000000e-01 : f32
    %91 = vector.broadcast %cst_41 : f32 to vector<8x256xf32>
    %92 = arith.mulf %91, %90 : vector<8x256xf32>
    %93 = math.tanh %92 : vector<8x256xf32>
    %cst_42 = arith.constant 1.000000e+00 : f32
    %94 = vector.broadcast %cst_42 : f32 to vector<8x256xf32>
    %95 = arith.addf %93, %94 : vector<8x256xf32>
    %cst_43 = arith.constant 5.000000e-01 : f32
    %96 = vector.broadcast %cst_43 : f32 to vector<8x256xf32>
    %97 = arith.mulf %96, %95 : vector<8x256xf32>
    %c0_44 = arith.constant 0 : index
    %c0_45 = arith.constant 0 : index
    %98 = vector.load %arg10[%c0_44, %c0_45] : memref<8x256xf32, #tpu.memory_space<vmem>>, vector<8x256xf32>
    tpu.vector_store %arg10[%c0_44, %c0_45], %97 {strides = array<i32>} : memref<8x256xf32, #tpu.memory_space<vmem>>, vector<8x256xf32>,
    return
  }
  func.func @transform_0(%arg0: i32) -> (i32, i32) {
    %c0_i32 = arith.constant 0 : i32
    %c0_i32_0 = arith.constant 0 : i32
    %c0_i32_1 = arith.constant 0 : i32
    return %c0_i32, %c0_i32_0 : i32, i32
  }
  func.func @transform_1(%arg0: i32) -> (i32, i32) {
    %c0_i32 = arith.constant 0 : i32
    %c0_i32_0 = arith.constant 0 : i32
    %c0_i32_1 = arith.constant 0 : i32
    return %c0_i32, %c0_i32_0 : i32, i32
  }
  func.func @transform_2(%arg0: i32) -> (i32, i32) {
    %c0_i32 = arith.constant 0 : i32
    %c0_i32_0 = arith.constant 0 : i32
    %c0_i32_1 = arith.constant 0 : i32
    return %c0_i32, %c0_i32_0 : i32, i32
  }
  func.func @transform_3(%arg0: i32) -> (i32, i32) {
    %c0_i32 = arith.constant 0 : i32
    %c0_i32_0 = arith.constant 0 : i32
    %c0_i32_1 = arith.constant 0 : i32
    return %c0_i32, %c0_i32_0 : i32, i32
  }
  func.func @transform_4(%arg0: i32) -> (i32, i32) {
    %c0_i32 = arith.constant 0 : i32
    %c0_i32_0 = arith.constant 0 : i32
    %c0_i32_1 = arith.constant 0 : i32
    return %c0_i32, %c0_i32_0 : i32, i32
  }
  func.func @transform_5(%arg0: i32) -> (i32, i32) {
    %c0_i32 = arith.constant 0 : i32
    %c0_i32_0 = arith.constant 0 : i32
    %c0_i32_1 = arith.constant 0 : i32
    return %c0_i32, %c0_i32_0 : i32, i32
  }
  func.func @transform_6(%arg0: i32) -> (i32, i32) {
    %c0_i32 = arith.constant 0 : i32
    %c0_i32_0 = arith.constant 0 : i32
    %c0_i32_1 = arith.constant 0 : i32
    return %c0_i32, %c0_i32_0 : i32, i32
  }
  func.func @transform_7(%arg0: i32) -> (i32, i32) {
    %c0_i32 = arith.constant 0 : i32
    %c0_i32_0 = arith.constant 0 : i32
    return %c0_i32, %arg0 : i32, i32
  }
  func.func @transform_8(%arg0: i32) -> (i32, i32) {
    %c0_i32 = arith.constant 0 : i32
    %c0_i32_0 = arith.constant 0 : i32
    return %c0_i32, %arg0 : i32, i32
  }
  func.func @transform_9(%arg0: i32) -> (i32, i32) {
    %c0_i32 = arith.constant 0 : i32
    %c0_i32_0 = arith.constant 0 : i32
    return %c0_i32, %arg0 : i32, i32
  }
}

</mosaic_0001>

<bundles_post_ra>
// kernel: decoder_forward.1
= control target key start
LH: loop header
LB: loop body
LE: loop exit
PB: predicated region body
PF: predicated region fallthrough
CT: control target
= control target key end

     0   :  { %14 = vsyncpa [#allocation3], 0  ;;  %s1329_s0 = inlined_call_operand.hbm [shape: f32[8,16], index: 0, kind: input, shape index: {}]   ;;  %s1330_s1 = inlined_call_operand.hbm [shape: bf16[16,64], index: 1, kind: input, shape index: {}]   ;;  %s1331_s2 = inlined_call_operand.hbm [shape: f32[1,64], index: 2, kind: input, shape index: {}]   ;;  %s1332_s3 = inlined_call_operand.hbm [shape: bf16[64,128], index: 3, kind: input, shape index: {}]   ;;  %s1333_s4 = inlined_call_operand.hbm [shape: f32[1,128], index: 4, kind: input, shape index: {}]   ;;  %s1334_s5 = inlined_call_operand.hbm [shape: bf16[128,256], index: 5, kind: input, shape index: {}]   ;;  %s1335_s6 = inlined_call_operand.vmem [shape: f32[1,256], index: 6, kind: input, shape index: {}]   ;;  %s1336_s7 = inlined_call_operand.hbm [shape: bf16[256,256], index: 7, kind: input, shape index: {}]   ;;  %s1337_s8 = inlined_call_operand.vmem [shape: f32[1,256], index: 8, kind: input, shape index: {}]   ;;  %s1338_s9 = inlined_call_operand.vmem [shape: f32[8,256], index: 9, kind: output, shape index: {}]  }
   0x1   :  { %15 = vsyncpa [#allocation5], 0 }
   0x2   :  { %16 = vsyncpa [#allocation8], 0  ;;  %s33_s11 = sshll.u32 %s1330_s1, 4  ;;  %s34_s11 = int_to_ptr.hbm [resolvable:$true] %s33_s11 }
   0x3   :  { %17 = vsyncpa [#allocation11], 0  ;;  %s1218_s12 = smov [#allocation4]   ;;  %s57_s16 = sshll.u32 %s1332_s3, 4  ;;  %s58_s16 = int_to_ptr.hbm [resolvable:$true] %s57_s16 }
   0x4   :  { %s35_s13 = sshll.u32 %s1218_s12, 4  ;;  %s1219_s17 = smov 64   ;;  %s36_s13 = int_to_ptr.vmem [resolvable:$true] %s35_s13 }
   0x5   :  { %s1220_s18 = smov 4   ;;  %s1221_s19 = smov [#allocation7]  }
   0x6   :  { %41 = dma.hbm_to_vmem [thread:$0]  %s34_s11, 128, %s36_s13, [#allocation5], %s1219_s17, %s1219_s17, %s1220_s18  }
   0x7   :  { %s59_s20 = sshll.u32 %s1221_s19, 4  ;;  %s81_s23 = sshll.u32 %s1334_s5, 4  ;;  %s60_s20 = int_to_ptr.vmem [resolvable:$true] %s59_s20  ;;  %s82_s23 = int_to_ptr.hbm [resolvable:$true] %s81_s23 }
   0x8   :  { %65 = dma.hbm_to_vmem [thread:$0]  %s58_s16, 512, %s60_s20, [#allocation8], %s1219_s17, %s1219_s17, %s1220_s18  }
   0x9   :  { %s1222_s1 = smov [#allocation10]   ;;  %s23_s3 = sshll.u32 %s1329_s0, 4  ;;  %s24_s3 = int_to_ptr.hbm [resolvable:$true] %s23_s3 }
   0xa   :  { %s83_s24 = sshll.u32 %s1222_s1, 4  ;;  %s1223_s27 = smov 128   ;;  %s84_s24 = int_to_ptr.vmem [resolvable:$true] %s83_s24 }
   0xb   :  { %s1224_s28 = smov 8   ;;  %s1225_s29 = smov [#allocation2]  }
   0xc   :  { %89 = dma.hbm_to_vmem [thread:$0]  %s82_s23, 2048, %s84_s24, [#allocation11], %s1223_s27, %s1223_s27, %s1224_s28  }
   0xd   :  { %s25_s30 = sshll.u32 %s1225_s29, 4  ;;  %s47_s5 = sshll.u32 %s1331_s2, 4  ;;  %s26_s30 = int_to_ptr.vmem [resolvable:$true] %s25_s30  ;;  %s48_s5 = int_to_ptr.hbm [resolvable:$true] %s47_s5 }
   0xe   :  { %28 = dma.hbm_to_vmem [thread:$0]  %s24_s3, 128, %s26_s30, [#allocation3]  }
   0xf   :  { %s71_s14 = sshll.u32 %s1333_s4, 4  ;;  %s1226_s15 = smov [#allocation6]   ;;  %s72_s14 = int_to_ptr.hbm [resolvable:$true] %s71_s14 }
  0x10   :  { %s49_s16 = sshll.u32 %s1226_s15, 4  ;;  %s1227_s0 = smov [#allocation9]   ;;  %s50_s16 = int_to_ptr.vmem [resolvable:$true] %s49_s16 }
  0x11   :  { %52 = dma.hbm_to_vmem [thread:$0]  %s48_s5, 16, %s50_s16, [#allocation5]  }
  0x12   :  { %s73_s17 = sshll.u32 %s1227_s0, 4  ;;  %s96_s20 = sshll.u32 %s1336_s7, 4  ;;  %s74_s17 = int_to_ptr.vmem [resolvable:$true] %s73_s17  ;;  %s97_s20 = int_to_ptr.hbm [resolvable:$true] %s96_s20 }
  0x13   :  { %76 = dma.hbm_to_vmem [thread:$0]  %s72_s14, 16, %s74_s17, [#allocation8]  }
  0x14   :  { %s1228_s2 = smov [#allocation12]  }
  0x15   :  { %s98_s21 = sshll.u32 %s1228_s2, 4  ;;  %s99_s21 = int_to_ptr.vmem [resolvable:$true] %s98_s21 }
  0x16   :  { %104 = dma.hbm_to_vmem [thread:$0]  %s97_s20, 4096, %s99_s21, [#allocation11], %s1223_s27, %s1223_s27, %s1224_s28  }
  0x17   :  { %1210 = dma.done.wait [#allocation3], 128  }
  0x18   :  { %1211 = vsyncadd [#allocation3], 4294967168 }
  0x19   :  { %1212 = dma.done.wait [#allocation5], 144  }
  0x1a   :  { %1213 = vsyncadd [#allocation5], 4294967152 }
  0x1b   :  { %1214 = dma.done.wait [#allocation8], 528  }
  0x1c   :  { %1215 = vsyncadd [#allocation8], 4294966768 }
  0x1d   :  { %1216 = dma.done.wait [#allocation11], 6144  }
  0x1e   :  { %1217 = vsyncadd [#allocation11], 4294961152  ;;  %v964_v0 = vld [vmem:[#allocation4] sm:$0xff]  ;;  %v136_v1 = vld [vmem:[#allocation2] sm:$0xff]  ;;  %vm150_vm0 = vcmask 130048   ;;  %vm167_vm1 = vcmask 523264  }
  0x1f   :  { %v137_v2 = vpack.c.bf16 %v136_v1, %v136_v1  ;;  %161 = vmatpush.bf16.msra.mxu0 %v964_v0  ;;  %v968_v3 = vld [vmem:[#allocation7 + $0x18] sm:$0xff]  ;;  %v967_v4 = vld [vmem:[#allocation7 + $0x10] sm:$0xff]  ;;  %v966_v5 = vld [vmem:[#allocation7 + $0x8] sm:$0xff] }
  0x20   :  { %246 = vmatpush.bf16.msra.mxu1 %v968_v3  ;;  %v965_v6 = vld [vmem:[#allocation7] sm:$0xff]  ;;  %v1028_v7 = vld [vmem:[#allocation6] ss:$0 sm:$0xff]  ;;  %v830_v43 = vld [vmem:[#allocation10 + $0x70] sm:$0xf] }
  0x21   :  { %v984_v44 = vld [vmem:[#allocation10 + $0x74] sm:$0xf0]  ;;  %v983_v45 = vld [vmem:[#allocation10 + $0x74] sm:$0xf]  ;;  %v832_v47 = vld [vmem:[#allocation10 + $0x78] sm:$0xf0] }
  0x22   :  { %754 = vmatmul.msk.bf16.vlgmr.msra.gmra.mxu0 %vm150_vm0, %v137_v2  ;;  %v831_v46 = vor.u32 %v984_v44, %v830_v43  ;;  %v822_v48 = vld [vmem:[#allocation10 + $0x60] sm:$0xf]  ;;  %v982_v49 = vld [vmem:[#allocation10 + $0x64] sm:$0xf0]  ;;  %v835_v50 = vor.u32 %v983_v45, %v832_v47  ;;  %v981_v51 = vld [vmem:[#allocation10 + $0x64] sm:$0xf] }
  0x23   :  { %v824_v52 = vld [vmem:[#allocation10 + $0x68] sm:$0xf0]  ;;  %v823_v53 = vor.u32 %v982_v49, %v822_v48  ;;  %v814_v55 = vld [vmem:[#allocation10 + $0x50] sm:$0xf]  ;;  %v980_v56 = vld [vmem:[#allocation10 + $0x54] sm:$0xf0] }
  0x24   :  { %247 = vmatpush.bf16.msra.mxu1 %v967_v4  ;;  %390 = vmatpush.bf16.msra.mxu2 %v831_v46  ;;  %v827_v54 = vor.u32 %v981_v51, %v824_v52  ;;  %v979_v57 = vld [vmem:[#allocation10 + $0x54] sm:$0xf]  ;;  %v816_v58 = vld [vmem:[#allocation10 + $0x58] sm:$0xf0]  ;;  %v815_v59 = vor.u32 %v980_v56, %v814_v55  ;;  %v806_v61 = vld [vmem:[#allocation10 + $0x40] sm:$0xf] }
  0x25   :  { %403 = vmatpush.bf16.msra.mxu3 %v835_v50  ;;  %v819_v60 = vor.u32 %v979_v57, %v816_v58  ;;  %v978_v62 = vld [vmem:[#allocation10 + $0x44] sm:$0xf0]  ;;  %v977_v63 = vld [vmem:[#allocation10 + $0x44] sm:$0xf]  ;;  %v808_v0 = vld [vmem:[#allocation10 + $0x48] sm:$0xf0] }
  0x26   :  { %v807_v1 = vor.u32 %v978_v62, %v806_v61  ;;  %v811_v2 = vor.u32 %v977_v63, %v808_v0  ;;  %v798_v3 = vld [vmem:[#allocation10 + $0x30] sm:$0xf]  ;;  %v976_v4 = vld [vmem:[#allocation10 + $0x34] sm:$0xf0] }
  0x27   :  { %v894_v61 = vld [vmem:[#allocation12 + $0x70] sm:$0xf]  ;;  %v1000_v62 = vld [vmem:[#allocation12 + $0x74] sm:$0xf0] }
  0x28   :  { %248 = vmatpush.bf16.msra.mxu1 %v966_v5  ;;  %391 = vmatpush.bf16.msra.mxu2 %v823_v53  ;;  %v975_v5 = vld [vmem:[#allocation10 + $0x34] sm:$0xf]  ;;  %v958_v63 = vld [vmem:[#allocation12 + $0xf0] sm:$0xf]  ;;  %v895_v0 = vor.u32 %v1000_v62, %v894_v61  ;;  %v1006_v62 = vld [vmem:[#allocation12 + $0xa4] sm:$0xf0] }
  0x29   :  { %404 = vmatpush.bf16.msra.mxu3 %v827_v54 }
  0x2a   :  { %680 = vmatpush.bf16.msrb.mxu0 %v895_v0  ;;  %v856_v0 = vld [vmem:[#allocation12 + $0x28] sm:$0xf0] }
  0x2c   :  { %249 = vmatpush.bf16.msra.mxu1 %v965_v6  ;;  %392 = vmatpush.bf16.msra.mxu2 %v815_v59  ;;  %v800_v6 = vld [vmem:[#allocation10 + $0x38] sm:$0xf0] }
  0x2d   :  { %405 = vmatpush.bf16.msra.mxu3 %v819_v60 }
  0x30   :  { %393 = vmatpush.bf16.msra.mxu2 %v807_v1  ;;  %v1016_v1 = vld [vmem:[#allocation12 + $0xf4] sm:$0xf0] }
  0x31   :  { %406 = vmatpush.bf16.msra.mxu3 %v811_v2  ;;  %v999_v2 = vld [vmem:[#allocation12 + $0x74] sm:$0xf] }
  0x9f   :  { %v163_v8 = vpop.f32.mrf.mxu0 }
  0xa0   :  { %v164_v9 = vadd.f32 %v1028_v7, %v163_v8  ;;  %v799_v7 = vor.u32 %v976_v4, %v798_v3  ;;  %v1029_v8 = vld [vmem:[#allocation9] ss:$0 sm:$0xff]  ;;  %v959_v4 = vor.u32 %v1016_v1, %v958_v63  ;;  %v989_v63 = vld [vmem:[#allocation12 + $0x24] sm:$0xf] }
  0xa1   :  { %v896_v3 = vld [vmem:[#allocation12 + $0x78] sm:$0xf0] }
  0xa2   :  { %v175_v10 = vmul.f32 %v164_v9, %v164_v9  ;;  %v168_v11 = vsel %vm167_vm1, %v164_v9, 0.0  ;;  %394 = vmatpush.bf16.msra.mxu2 %v799_v7  ;;  %v960_v7 = vld [vmem:[#allocation12 + $0xf8] sm:$0xf0]  ;;  %693 = vmatpush.bf16.msrb.mxu1 %v959_v4 }
  0xa3   :  { %v169_v12 = vrot.slane %v168_v11, 4 }
  0xa4   :  { %v176_v13 = vsel %vm167_vm1, %v175_v10, 0.0  ;;  %v790_v10 = vld [vmem:[#allocation10 + $0x20] sm:$0xf] }
  0xa5   :  { %v170_v14 = vadd.f32 %v169_v12, %v168_v11  ;;  %v177_v15 = vrot.slane %v176_v13, 4  ;;  %v974_v11 = vld [vmem:[#allocation10 + $0x24] sm:$0xf0]  ;;  %v973_v12 = vld [vmem:[#allocation10 + $0x24] sm:$0xf] }
  0xa7   :  { %v165_v16 = vpop.f32.mrf.mxu0  ;;  %v171_v17 = vrot.slane %v170_v14, 2  ;;  %v178_v18 = vadd.f32 %v177_v15, %v176_v13  ;;  %v792_v13 = vld [vmem:[#allocation10 + $0x28] sm:$0xf0]  ;;  %v791_v15 = vor.u32 %v974_v11, %v790_v10  ;;  %v998_v10 = vld [vmem:[#allocation12 + $0x64] sm:$0xf0] }
  0xa8   :  { %v950_v11 = vld [vmem:[#allocation12 + $0xe0] sm:$0xf] }
  0xa9   :  { %v172_v19 = vadd.f32 %v171_v17, %v170_v14  ;;  %v179_v20 = vrot.slane %v178_v18, 2  ;;  %v795_v17 = vor.u32 %v973_v12, %v792_v13  ;;  %395 = vmatpush.bf16.msra.mxu2 %v791_v15  ;;  %v1014_v12 = vld [vmem:[#allocation12 + $0xe4] sm:$0xf0]  ;;  %v997_v15 = vld [vmem:[#allocation12 + $0x64] sm:$0xf] }
  0xab   :  { %v173_v21 = vrot.slane %v172_v19, 1  ;;  %v180_v22 = vadd.f32 %v179_v20, %v178_v18  ;;  %v782_v18 = vld [vmem:[#allocation10 + $0x10] sm:$0xf]  ;;  %v971_v20 = vld [vmem:[#allocation10 + $0x14] sm:$0xf] }
  0xad   :  { %v174_v23 = vadd.f32 %v173_v21, %v172_v19  ;;  %v181_v24 = vrot.slane %v180_v22, 1  ;;  %v972_v19 = vld [vmem:[#allocation10 + $0x14] sm:$0xf0]  ;;  %v784_v21 = vld [vmem:[#allocation10 + $0x18] sm:$0xf0] }
  0xaf   :  { %v182_v25 = vadd.f32 %v181_v24, %v180_v22  ;;  %v183_v26 = vmul.f32 0.125, %v174_v23  ;;  %v783_v24 = vor.u32 %v972_v19, %v782_v18  ;;  %v952_v19 = vld [vmem:[#allocation12 + $0xe8] sm:$0xf0] }
  0xb1   :  { %v184_v27 = vmul.f32 0.125, %v182_v25  ;;  %v185_v28 = vmul.f32 %v183_v26, %v183_v26  ;;  %v188_v38 = vsub.f32 %v164_v9, %v183_v26  ;;  %v803_v9 = vor.u32 %v975_v5, %v800_v6  ;;  %396 = vmatpush.bf16.msra.mxu2 %v783_v24  ;;  %v1015_v6 = vld [vmem:[#allocation12 + $0xf4] sm:$0xf]  ;;  %v1012_v24 = vld [vmem:[#allocation12 + $0xd4] sm:$0xf0] }
  0xb2   :  { %v899_v5 = vor.u32 %v999_v2, %v896_v3 }
  0xb3   :  { %v186_v29 = vsub.f32 %v184_v27, %v185_v28  ;;  %407 = vmatpush.bf16.msra.mxu3 %v803_v9  ;;  %v787_v27 = vor.u32 %v971_v20, %v784_v21  ;;  %v774_v28 = vld [vmem:[#allocation10] sm:$0xf]  ;;  %v963_v9 = vor.u32 %v1015_v6, %v960_v7  ;;  %v878_v20 = vld [vmem:[#allocation12 + $0x50] sm:$0xf]  ;;  %v996_v21 = vld [vmem:[#allocation12 + $0x54] sm:$0xf0] }
  0xb4   :  { %v1005_v6 = vld [vmem:[#allocation12 + $0xa4] sm:$0xf]  ;;  %v920_v7 = vld [vmem:[#allocation12 + $0xa8] sm:$0xf0] }
  0xb5   :  { %v187_v30 = vmax.f32 %v186_v29, 0.0  ;;  %v970_v29 = vld [vmem:[#allocation10 + $0x4] sm:$0xf0] }
  0xb7   :  { %v189_v31 = vadd.f32 1e-05, %v187_v30  ;;  %408 = vmatpush.bf16.msra.mxu3 %v795_v17  ;;  %v969_v30 = vld [vmem:[#allocation10 + $0x4] sm:$0xf] }
  0xb8   :  { %v1013_v17 = vld [vmem:[#allocation12 + $0xe4] sm:$0xf] }
  0xb9   :  { %1030 = vrsqrt.f32 %v189_v31  ;;  %vm196_vm3 = vweird.f32 %v189_v31 }
  0xbb   :  { %409 = vmatpush.bf16.msra.mxu3 %v787_v27  ;;  %v880_v27 = vld [vmem:[#allocation12 + $0x58] sm:$0xf0] }
  0xbf   :  { %v1031_v32 = vpop.eup %1030 }
  0xc0   :  { %v191_v33 = vmul.f32 %v1031_v32, %v189_v31  ;;  %vm197_vm2 = vweird.f32 %v1031_v32  ;;  %v776_v31 = vld [vmem:[#allocation10 + $0x8] sm:$0xf0] }
  0xc1   :  { %vm198_vm4 = vmor %vm196_vm3, %vm197_vm2 }
  0xc2   :  { %v192_v34 = vmul.f32 %v1031_v32, %v191_v33 }
  0xc4   :  { %v193_v35 = vmul.f32 0.5, %v192_v34 }
  0xc6   :  { %v194_v36 = vsub.f32 1.5, %v193_v35  ;;  %v775_v35 = vor.u32 %v970_v29, %v774_v28  ;;  %v1011_v28 = vld [vmem:[#allocation12 + $0xd4] sm:$0xf]  ;;  %v944_v29 = vld [vmem:[#allocation12 + $0xd8] sm:$0xf0] }
  0xc8   :  { %v195_v37 = vmul.f32 %v1031_v32, %v194_v36  ;;  %397 = vmatpush.bf16.msra.mxu2 %v775_v35  ;;  %v947_v35 = vor.u32 %v1011_v28, %v944_v29  ;;  %v838_v28 = vld [vmem:[#allocation12] sm:$0xf] }
  0xca   :  { %v199_v39 = vsel %vm198_vm4, %v1031_v32, %v195_v37  ;;  %v779_v37 = vor.u32 %v969_v30, %v776_v31 }
  0xcb   :  { %v200_v40 = vmul.f32 %v199_v39, %v188_v38 }
  0xcc   :  { %410 = vmatpush.bf16.msra.mxu3 %v779_v37  ;;  %706 = vmatpush.bf16.msrb.mxu2 %v899_v5  ;;  %v993_v37 = vld [vmem:[#allocation12 + $0x44] sm:$0xf] }
  0xcd   :  { %v201_v41 = vmax.f32 %v200_v40, 0.0 }
  0xcf   :  { %v202_v42 = vpack.c.bf16 %v201_v41, %v201_v41 }
  0xd0   :  { %719 = vmatpush.bf16.msrb.mxu3 %v963_v9 }
  0xd1   :  { %771 = vmatmul.msk.bf16.vlgmr.msra.gmra.mxu1 %vm167_vm1, %v202_v42 }
 0x14e   :  { %v251_v14 = vpop.f32.mrf.mxu1 }
 0x14f   :  { %v252_v16 = vadd.f32 %v1029_v8, %v251_v14  ;;  %v886_v8 = vld [vmem:[#allocation12 + $0x60] sm:$0xf]  ;;  %v951_v14 = vor.u32 %v1014_v12, %v950_v11  ;;  %v859_v11 = vor.u32 %v989_v63, %v856_v0  ;;  %v988_v12 = vld [vmem:[#allocation12 + $0x14] sm:$0xf0] }
 0x150   :  { %v887_v13 = vor.u32 %v998_v10, %v886_v8  ;;  %v846_v8 = vld [vmem:[#allocation12 + $0x10] sm:$0xf] }
 0x151   :  { %v255_v22 = vrot.slane %v252_v16, 4  ;;  %v261_v23 = vmul.f32 %v252_v16, %v252_v16  ;;  %694 = vmatpush.bf16.msrb.mxu1 %v951_v14  ;;  %v1004_v14 = vld [vmem:[#allocation12 + $0x94] sm:$0xf0]  ;;  %v847_v29 = vor.u32 %v988_v12, %v846_v8 }
 0x152   :  { %681 = vmatpush.bf16.msrb.mxu0 %v887_v13  ;;  %v910_v13 = vld [vmem:[#allocation12 + $0x90] sm:$0xf] }
 0x153   :  { %v256_v25 = vadd.f32 %v255_v22, %v252_v16  ;;  %v262_v26 = vrot.slane %v261_v23, 4  ;;  %v955_v22 = vor.u32 %v1013_v17, %v952_v19  ;;  %v987_v19 = vld [vmem:[#allocation12 + $0x14] sm:$0xf] }
 0x155   :  { %v257_v32 = vrot.slane %v256_v25, 2  ;;  %v263_v33 = vadd.f32 %v262_v26, %v261_v23  ;;  %v942_v23 = vld [vmem:[#allocation12 + $0xd0] sm:$0xf]  ;;  %v879_v26 = vor.u32 %v996_v21, %v878_v20  ;;  %720 = vmatpush.bf16.msrb.mxu3 %v955_v22  ;;  %v848_v20 = vld [vmem:[#allocation12 + $0x18] sm:$0xf0]  ;;  %v923_v21 = vor.u32 %v1005_v6, %v920_v7 }
 0x156   :  { %v253_v34 = vpop.f32.mrf.mxu1  ;;  %v943_v30 = vor.u32 %v1012_v24, %v942_v23  ;;  %v1003_v22 = vld [vmem:[#allocation12 + $0x94] sm:$0xf] }
 0x157   :  { %v264_v36 = vrot.slane %v263_v33, 2  ;;  %v258_v38 = vadd.f32 %v257_v32, %v256_v25  ;;  %v995_v25 = vld [vmem:[#allocation12 + $0x54] sm:$0xf]  ;;  %v870_v32 = vld [vmem:[#allocation12 + $0x40] sm:$0xf]  ;;  %682 = vmatpush.bf16.msrb.mxu0 %v879_v26 }
 0x158   :  { %v883_v31 = vor.u32 %v995_v25, %v880_v27  ;;  %v934_v34 = vld [vmem:[#allocation12 + $0xc0] sm:$0xf]  ;;  %695 = vmatpush.bf16.msrb.mxu1 %v943_v30  ;;  %v912_v27 = vld [vmem:[#allocation12 + $0x98] sm:$0xf0]  ;;  %v911_v30 = vor.u32 %v1004_v14, %v910_v13 }
 0x159   :  { %v265_v39 = vadd.f32 %v264_v36, %v263_v33  ;;  %v259_v40 = vrot.slane %v258_v38, 1  ;;  %v994_v33 = vld [vmem:[#allocation12 + $0x44] sm:$0xf0]  ;;  %721 = vmatpush.bf16.msrb.mxu3 %v947_v35 }
 0x15a   :  { %v1010_v36 = vld [vmem:[#allocation12 + $0xc4] sm:$0xf0] }
 0x15b   :  { %v266_v41 = vrot.slane %v265_v39, 1  ;;  %v260_v42 = vadd.f32 %v259_v40, %v258_v38  ;;  %v872_v38 = vld [vmem:[#allocation12 + $0x48] sm:$0xf0] }
 0x15c   :  { %v936_v40 = vld [vmem:[#allocation12 + $0xc8] sm:$0xf0] }
 0x15d   :  { %v267_v43 = vadd.f32 %v266_v41, %v265_v39  ;;  %v268_v44 = vmul.f32 0.125, %v260_v42  ;;  %v1009_v39 = vld [vmem:[#allocation12 + $0xc4] sm:$0xf]  ;;  %v304_v41 = vld [vmem:[%s1335_s6] sm:$0x3]  ;;  %v871_v42 = vor.u32 %v994_v33, %v870_v32 }
 0x15e   :  { %v986_v32 = vld [vmem:[#allocation12 + $0x4] sm:$0xf0]  ;;  %v902_v33 = vld [vmem:[#allocation12 + $0x80] sm:$0xf] }
 0x15f   :  { %v269_v45 = vmul.f32 0.125, %v267_v43  ;;  %v270_v46 = vmul.f32 %v268_v44, %v268_v44  ;;  %v273_v56 = vsub.f32 %v252_v16, %v268_v44  ;;  %v888_v16 = vld [vmem:[#allocation12 + $0x68] sm:$0xf0]  ;;  %v935_v43 = vor.u32 %v1010_v36, %v934_v34  ;;  %683 = vmatpush.bf16.msrb.mxu0 %v871_v42  ;;  %v1002_v34 = vld [vmem:[#allocation12 + $0x84] sm:$0xf0] }
 0x160   :  { %v891_v18 = vor.u32 %v997_v15, %v888_v16  ;;  %v875_v44 = vor.u32 %v993_v37, %v872_v38 }
 0x161   :  { %v271_v47 = vsub.f32 %v269_v45, %v270_v46  ;;  %v862_v45 = vld [vmem:[#allocation12 + $0x30] sm:$0xf]  ;;  %v992_v46 = vld [vmem:[#allocation12 + $0x34] sm:$0xf0]  ;;  %696 = vmatpush.bf16.msrb.mxu1 %v935_v43  ;;  %v915_v43 = vor.u32 %v1003_v22, %v912_v27 }
 0x162   :  { %707 = vmatpush.bf16.msrb.mxu2 %v891_v18 }
 0x163   :  { %v272_v48 = vmax.f32 %v271_v47, 0.0  ;;  %v926_v47 = vld [vmem:[#allocation12 + $0xb0] sm:$0xf] }
 0x165   :  { %v274_v49 = vadd.f32 1e-05, %v272_v48  ;;  %v939_v48 = vor.u32 %v1009_v39, %v936_v40  ;;  %v985_v39 = vld [vmem:[#allocation12 + $0x4] sm:$0xf]  ;;  %v840_v40 = vld [vmem:[#allocation12 + $0x8] sm:$0xf0] }
 0x166   :  { %708 = vmatpush.bf16.msrb.mxu2 %v883_v31  ;;  %v851_v31 = vor.u32 %v987_v19, %v848_v20 }
 0x167   :  { %1032 = vrsqrt.f32 %v274_v49  ;;  %vm281_vm6 = vweird.f32 %v274_v49  ;;  %722 = vmatpush.bf16.msrb.mxu3 %v939_v48  ;;  %v1001_v48 = vld [vmem:[#allocation12 + $0x84] sm:$0xf] }
 0x16a   :  { %709 = vmatpush.bf16.msrb.mxu2 %v875_v44 }
 0x16d   :  { %v1033_v50 = vpop.eup %1032 }
 0x16e   :  { %v276_v51 = vmul.f32 %v1033_v50, %v274_v49  ;;  %vm282_vm5 = vweird.f32 %v1033_v50  ;;  %v1008_v49 = vld [vmem:[#allocation12 + $0xb4] sm:$0xf0] }
 0x16f   :  { %vm283_vm7 = vmor %vm281_vm6, %vm282_vm5 }
 0x170   :  { %v277_v52 = vmul.f32 %v1033_v50, %v276_v51  ;;  %v864_v51 = vld [vmem:[#allocation12 + $0x38] sm:$0xf0] }
 0x172   :  { %v278_v53 = vmul.f32 0.5, %v277_v52  ;;  %v306_v52 = vperm.slane %v304_v41, 0 }
 0x174   :  { %v279_v54 = vsub.f32 1.5, %v278_v53  ;;  %v307_v53 = vperm.slane %v304_v41, 1 }
 0x176   :  { %v280_v55 = vmul.f32 %v1033_v50, %v279_v54  ;;  %v1007_v54 = vld [vmem:[#allocation12 + $0xb4] sm:$0xf] }
 0x178   :  { %v284_v57 = vsel %vm283_vm7, %v1033_v50, %v280_v55  ;;  %v991_v50 = vld [vmem:[#allocation12 + $0x34] sm:$0xf]  ;;  %v928_v55 = vld [vmem:[#allocation12 + $0xb8] sm:$0xf0] }
 0x179   :  { %v285_v58 = vmul.f32 %v284_v57, %v273_v56  ;;  %v863_v56 = vor.u32 %v992_v46, %v862_v45  ;;  %v854_v57 = vld [vmem:[#allocation12 + $0x20] sm:$0xf]  ;;  %v867_v61 = vor.u32 %v991_v50, %v864_v51  ;;  %v931_v3 = vor.u32 %v1007_v54, %v928_v55 }
 0x17a   :  { %v839_v50 = vor.u32 %v986_v32, %v838_v28  ;;  %v903_v51 = vor.u32 %v1002_v34, %v902_v33 }
 0x17b   :  { %v286_v59 = vmax.f32 %v285_v58, 0.0  ;;  %v990_v58 = vld [vmem:[#allocation12 + $0x24] sm:$0xf0]  ;;  %684 = vmatpush.bf16.msrb.mxu0 %v863_v56  ;;  %710 = vmatpush.bf16.msrb.mxu2 %v867_v61 }
 0x17c   :  { %v855_v9 = vor.u32 %v990_v58, %v854_v57  ;;  %723 = vmatpush.bf16.msrb.mxu3 %v931_v3 }
 0x17d   :  { %v287_v60 = vpack.c.bf16 %v286_v59, %v286_v59  ;;  %v918_v59 = vld [vmem:[#allocation12 + $0xa0] sm:$0xf] }
 0x17e   :  { %v919_v10 = vor.u32 %v1006_v62, %v918_v59 }
 0x17f   :  { %398 = vmatmul.bf16.vlgmr.msra.gmra.mxu2 %v287_v60  ;;  %411 = vmatmul.bf16.vlgmr.msra.gmra.mxu3 %v287_v60  ;;  %v927_v60 = vor.u32 %v1008_v49, %v926_v47  ;;  %v904_v49 = vld [vmem:[#allocation12 + $0x88] sm:$0xf0] }
 0x180   :  { %685 = vmatpush.bf16.msrb.mxu0 %v855_v9  ;;  %711 = vmatpush.bf16.msrb.mxu2 %v859_v11  ;;  %v907_v57 = vor.u32 %v1001_v48, %v904_v49 }
 0x181   :  { %697 = vmatpush.bf16.msrb.mxu1 %v927_v60  ;;  %724 = vmatpush.bf16.msrb.mxu3 %v923_v21 }
 0x184   :  { %686 = vmatpush.bf16.msrb.mxu0 %v847_v29  ;;  %712 = vmatpush.bf16.msrb.mxu2 %v851_v31 }
 0x185   :  { %698 = vmatpush.bf16.msrb.mxu1 %v919_v10  ;;  %725 = vmatpush.bf16.msrb.mxu3 %v915_v43 }
 0x188   :  { %687 = vmatpush.bf16.msrb.mxu0 %v839_v50 }
 0x189   :  { %699 = vmatpush.bf16.msrb.mxu1 %v911_v30  ;;  %726 = vmatpush.bf16.msrb.mxu3 %v907_v57 }
 0x18d   :  { %700 = vmatpush.bf16.msrb.mxu1 %v903_v51 }
 0x202   :  { %v399_v1 = vpop.f32.mrf.mxu2  ;;  %v412_v2 = vpop.f32.mrf.mxu3 }
 0x203   :  { %v1306_v4 = vadd.f32 %v399_v1, %v306_v52  ;;  %v1308_v5 = vadd.f32 %v412_v2, %v307_v53  ;;  %v843_v52 = vor.u32 %v985_v39, %v840_v40 }
 0x205   :  { %v416_v15 = vrot.slane %v1306_v4, 4  ;;  %v428_v16 = vmul.f32 %v1306_v4, %v1306_v4  ;;  %v422_v17 = vrot.slane %v1308_v5, 4  ;;  %v429_v18 = vmul.f32 %v1308_v5, %v1308_v5  ;;  %713 = vmatpush.bf16.msrb.mxu2 %v843_v52 }
 0x207   :  { %v417_v23 = vadd.f32 %v416_v15, %v1306_v4  ;;  %v430_v24 = vrot.slane %v428_v16, 4  ;;  %v423_v25 = vadd.f32 %v422_v17, %v1308_v5  ;;  %v436_v26 = vrot.slane %v429_v18, 4 }
 0x209   :  { %v418_v35 = vrot.slane %v417_v23, 2  ;;  %v431_v36 = vadd.f32 %v430_v24, %v428_v16  ;;  %v424_v37 = vrot.slane %v423_v25, 2  ;;  %v437_v38 = vadd.f32 %v436_v26, %v429_v18 }
 0x20a   :  { %v401_v41 = vpop.f32.mrf.mxu2  ;;  %v414_v42 = vpop.f32.mrf.mxu3 }
 0x20b   :  { %v419_v44 = vadd.f32 %v418_v35, %v417_v23  ;;  %v432_v45 = vrot.slane %v431_v36, 2  ;;  %v425_v46 = vadd.f32 %v424_v37, %v423_v25  ;;  %v438_v47 = vrot.slane %v437_v38, 2 }
 0x20d   :  { %v433_v53 = vadd.f32 %v432_v45, %v431_v36  ;;  %v439_v54 = vadd.f32 %v438_v47, %v437_v38  ;;  %v420_v55 = vrot.slane %v419_v44, 1  ;;  %v426_v56 = vrot.slane %v425_v46, 1 }
 0x20f   :  { %v434_v58 = vrot.slane %v433_v53, 1  ;;  %v440_v59 = vrot.slane %v439_v54, 1  ;;  %v421_v60 = vadd.f32 %v420_v55, %v419_v44  ;;  %v427_v61 = vadd.f32 %v426_v56, %v425_v46 }
 0x211   :  { %v435_v62 = vadd.f32 %v434_v58, %v433_v53  ;;  %v441_v63 = vadd.f32 %v440_v59, %v439_v54  ;;  %v442_v0 = vmul.f32 0.125, %v421_v60  ;;  %v443_v1 = vmul.f32 0.125, %v427_v61 }
 0x213   :  { %v444_v2 = vmul.f32 0.125, %v435_v62  ;;  %v446_v3 = vmul.f32 %v442_v0, %v442_v0  ;;  %v445_v6 = vmul.f32 0.125, %v441_v63  ;;  %v447_v7 = vmul.f32 %v443_v1, %v443_v1 }
 0x214   :  { %v452_v25 = vsub.f32 %v1306_v4, %v442_v0  ;;  %v453_v28 = vsub.f32 %v1308_v5, %v443_v1  ;;  %v514_v4 = vld [vmem:[%s1337_s8] sm:$0x3] }
 0x215   :  { %v448_v8 = vsub.f32 %v444_v2, %v446_v3  ;;  %v449_v9 = vsub.f32 %v445_v6, %v447_v7  ;;  %v516_v36 = vperm.slane %v514_v4, 0  ;;  %v517_v40 = vperm.slane %v514_v4, 1 }
 0x217   :  { %v450_v10 = vmax.f32 %v448_v8, 0.0  ;;  %v451_v11 = vmax.f32 %v449_v9, 0.0 }
 0x219   :  { %v454_v12 = vadd.f32 1e-05, %v450_v10  ;;  %v455_v13 = vadd.f32 1e-05, %v451_v11 }
 0x21b   :  { %1034 = vrsqrt.f32 %v454_v12  ;;  %vm462_vm10 = vweird.f32 %v454_v12  ;;  %vm472_vm12 = vweird.f32 %v455_v13 }
 0x21c   :  { %1036 = vrsqrt.f32 %v455_v13 }
 0x221   :  { %v1035_v14 = vpop.eup %1034 }
 0x222   :  { %v1037_v15 = vpop.eup %1036  ;;  %v457_v16 = vmul.f32 %v1035_v14, %v454_v12  ;;  %vm463_vm8 = vweird.f32 %v1035_v14 }
 0x223   :  { %v467_v17 = vmul.f32 %v1037_v15, %v455_v13  ;;  %vm473_vm9 = vweird.f32 %v1037_v15  ;;  %vm464_vm11 = vmor %vm462_vm10, %vm463_vm8 }
 0x224   :  { %v458_v18 = vmul.f32 %v1035_v14, %v457_v16  ;;  %vm474_vm13 = vmor %vm472_vm12, %vm473_vm9 }
 0x225   :  { %v468_v19 = vmul.f32 %v1037_v15, %v467_v17 }
 0x226   :  { %v459_v20 = vmul.f32 0.5, %v458_v18 }
 0x227   :  { %v469_v21 = vmul.f32 0.5, %v468_v19 }
 0x228   :  { %v460_v22 = vsub.f32 1.5, %v459_v20 }
 0x229   :  { %v470_v23 = vsub.f32 1.5, %v469_v21 }
 0x22a   :  { %v461_v24 = vmul.f32 %v1035_v14, %v460_v22 }
 0x22b   :  { %v471_v26 = vmul.f32 %v1037_v15, %v470_v23 }
 0x22c   :  { %v465_v27 = vsel %vm464_vm11, %v1035_v14, %v461_v24 }
 0x22d   :  { %v476_v29 = vmul.f32 %v465_v27, %v452_v25  ;;  %v475_v30 = vsel %vm474_vm13, %v1037_v15, %v471_v26 }
 0x22e   :  { %v477_v31 = vmul.f32 %v475_v30, %v453_v28 }
 0x22f   :  { %v478_v32 = vmax.f32 %v476_v29, 0.0 }
 0x230   :  { %v479_v33 = vmax.f32 %v477_v31, 0.0 }
 0x231   :  { %v480_v34 = vpack.c.bf16 %v478_v32, %v478_v32 }
 0x232   :  { %v481_v35 = vpack.c.bf16 %v479_v33, %v479_v33 }
 0x233   :  { %688 = vmatmul.bf16.vlgmr.msrb.gmra.mxu0 %v480_v34  ;;  %714 = vmatmul.bf16.vlgmr.msrb.gmra.mxu2 %v480_v34 }
 0x234   :  { %701 = vmatmul.bf16.vlgmr.msrb.gmra.mxu1 %v481_v35  ;;  %727 = vmatmul.bf16.vlgmr.msrb.gmra.mxu3 %v481_v35 }
 0x2b0   :  { %v689_v37 = vpop.f32.mrf.mxu0 }
 0x2b1   :  { %v690_v38 = vadd.f32 %v689_v37, %v516_v36  ;;  %v702_v5 = vpop.f32.mrf.mxu1 }
 0x2b3   :  { %v703_v39 = vadd.f32 %v702_v5, %v690_v38 }
 0x2b5   :  { %v732_v41 = vmul.f32 0.5, %v703_v39 }
 0x2b6   :  { %v715_v42 = vpop.f32.mrf.mxu2 }
 0x2b7   :  { %1038 = vtanh.f32 %v732_v41  ;;  %v716_v43 = vadd.f32 %v715_v42, %v517_v40  ;;  %v728_v44 = vpop.f32.mrf.mxu3 }
 0x2b8   :  { %v691_v45 = vpop.f32.mrf.mxu0 }
 0x2b9   :  { %v729_v46 = vadd.f32 %v728_v44, %v716_v43  ;;  %v704_v47 = vpop.f32.mrf.mxu1 }
 0x2bb   :  { %v733_v48 = vmul.f32 0.5, %v729_v46 }
 0x2bd   :  { %v1039_v49 = vpop.eup %1038  ;;  %1040 = vtanh.f32 %v733_v48 }
 0x2be   :  { %v736_v50 = vadd.f32 1.0, %v1039_v49  ;;  %v717_v51 = vpop.f32.mrf.mxu2 }
 0x2bf   :  { %v730_v52 = vpop.f32.mrf.mxu3 }
 0x2c0   :  { %v738_v53 = vmul.f32 0.5, %v736_v50 }
 0x2c2   :  { %740 = vst [vmem:[%s1338_s9] sm:$0xff] %v738_v53 }
 0x2c3   :  { %v1041_v54 = vpop.eup %1040 }
 0x2c4   :  { %v737_v55 = vadd.f32 1.0, %v1041_v54 }
 0x2c6   :  { %v739_v56 = vmul.f32 0.5, %v737_v55 }
 0x2c8   :  { %741 = vst [vmem:[%s1338_s9 + $0x8] sm:$0xff] %v739_v56 }
 0x2c9   :  { %746 = vsyncpa [#allocation3], 1 }
 0x2ca   :  { %747 = vsyncpa [#allocation5], 1 }
 0x2cb   :  { %748 = vsyncpa [#allocation8], 1 }
 0x2cc   :  { %749 = vsyncpa [#allocation11], 1 }

</bundles_post_ra>
